<compile_context>
chip_gen: v7x
topology: tpu7x:2x2x1
jax: 0.10.0
libtpu: 0.0.40
codegen_flags: <defaults>
</compile_context>

<pallas_src>
import functools

import jax
import jax.numpy as jnp
from jax.experimental import pallas as pl
from jax.experimental.pallas import tpu as pltpu


def _lora_kernel(*refs, has_bias, has_base, cast_h):
    # refs = (x, a, b, [bias], [base], out)
    x_ref, a_ref, b_ref = refs[0], refs[1], refs[2]
    o_ref = refs[-1]
    idx = 3
    bias_ref = None
    base_ref = None
    if has_bias:
        bias_ref = refs[idx]
        idx += 1
    if has_base:
        base_ref = refs[idx]
        idx += 1

    # (TM, Din) @ (Din, r) -> (TM, r) on the MXU, f32 accumulation.
    h = jnp.dot(x_ref[...], a_ref[...], preferred_element_type=jnp.float32)
    if cast_h:
        h = h.astype(b_ref.dtype)          # bf16 LHS for the second MXU pass
    out = jnp.dot(h, b_ref[...], preferred_element_type=jnp.float32)
    if bias_ref is not None:
        out = out + bias_ref[...].astype(jnp.float32)
    if base_ref is not None:
        out = out + base_ref[...].astype(jnp.float32)
    o_ref[...] = out.astype(o_ref.dtype)


def _round_up(v, m):
    return ((v + m - 1) // m) * m


def _round_down(v, m):
    return (v // m) * m


def _vmem_capacity_bytes():
    """Per-core VMEM capacity; conservative 64 MiB (v7x) fallback."""
    try:
        cap = int(getattr(pltpu.get_tpu_info(), "vmem_capacity_bytes", 0))
        if cap > 0:
            return cap
    except Exception:
        pass
    return 64 * 1024 * 1024


def _choose_tm(m, din, dout, r, itemsize, has_base, vmem_cap):
    """Largest row tile whose double-buffered streamed tiles fit the
    weight-adjusted VMEM budget, rounded to the dtype sublane tile."""
    sublane = max(8, 32 // itemsize)                 # 8 f32 / 16 bf16 / 32 int8
    # Streamed per-row bytes (double-buffered): x + out (+ aliased base input).
    per_row = 2 * (din + dout + (dout if has_base else 0)) * itemsize
    # Resident weights + bias (conservatively count the default 2 buffers).
    weight_bytes = 2 * (din * r + r * dout + dout) * itemsize
    budget = (vmem_cap * 3) // 4 - weight_bytes - (4 << 20)

    tm = max(sublane, _round_down(max(budget, 0) // per_row, sublane))
    if tm >= 256:
        tm = _round_down(tm, 128)                    # prefer lane-friendly tiles
    tm_cap = 2048 if vmem_cap >= (96 << 20) else 1024
    tm = min(tm, tm_cap)

    m_aligned = _round_up(m, sublane)
    tm = min(tm, m_aligned)
    # Guarantee >= 2 grid steps when possible (dual-TC sharding on v7x and
    # DMA/compute overlap even for small-batch / decode shapes).
    if m_aligned >= 2 * sublane and pl.cdiv(m, tm) < 2:
        tm = _round_up(pl.cdiv(m, 2), sublane)
    return max(sublane, tm)


def lora_linear_forward(x, lora_A, lora_B, b=None, scaling=1.0, base=None,
                        tm=None):
    """LoRALinear forward (lora_head=False path).

    x:      (B, N, Din)
    lora_A: (r, Din)
    lora_B: (Dout, r)
    b:      (Dout,) or None
    base:   optional (B, N, Dout) fused as `base + lora(x)` (residual add,
            aliased in-place to the output buffer).
    Returns (B, N, Dout).
    """
    B, N, Din = x.shape
    Dout, r = lora_B.shape
    M = B * N
    itemsize = jnp.dtype(x.dtype).itemsize
    vmem_cap = _vmem_capacity_bytes()
    has_bias = b is not None
    has_base = base is not None
    sublane = max(8, 32 // itemsize)

    if tm is None:
        tm = _choose_tm(M, Din, Dout, r, itemsize, has_base, vmem_cap)
    else:
        tm = max(sublane, _round_up(int(tm), sublane))
    num_tiles = pl.cdiv(M, tm)   # ragged last block: OOB output rows are masked

    x2d = x.reshape(M, Din)
    # Fold scaling + transpose the tiny weight matrices once at trace time.
    a_t = (lora_A * scaling).astype(x.dtype).T        # (Din, r)
    b_t = lora_B.astype(x.dtype).T                    # (r, Dout)

    operands = [x2d, a_t, b_t]
    in_specs = [
        pl.BlockSpec((tm, Din), lambda i: (i, 0)),    # streamed activations
        pl.BlockSpec((Din, r), lambda i: (0, 0)),     # resident (A*scaling)^T
        pl.BlockSpec((r, Dout), lambda i: (0, 0)),    # resident B^T
    ]
    if has_bias:
        bias2d = (b * scaling).astype(x.dtype).reshape(1, Dout)
        operands.append(bias2d)
        in_specs.append(pl.BlockSpec((1, Dout), lambda i: (0, 0)))
    io_aliases = {}
    if has_base:
        base2d = base.astype(x.dtype).reshape(M, Dout)
        io_aliases = {len(operands): 0}               # alias base -> output
        operands.append(base2d)
        in_specs.append(pl.BlockSpec((tm, Dout), lambda i: (i, 0)))

    # Explicit VMEM limit: double-buffered streamed tiles + weights + headroom,
    # clamped below the physical per-core capacity.
    tile_bytes = 2 * tm * (Din + Dout + (Dout if has_base else 0)) * itemsize
    weight_bytes = 2 * (Din * r + r * Dout + Dout) * itemsize
    vmem_limit = int(min(max(tile_bytes + weight_bytes + (4 << 20), 16 << 20),
                         vmem_cap - (8 << 20)))

    kernel = functools.partial(
        _lora_kernel, has_bias=has_bias, has_base=has_base,
        cast_h=(x.dtype == jnp.bfloat16))

    out2d = pl.pallas_call(
        kernel,
        out_shape=jax.ShapeDtypeStruct((M, Dout), x.dtype),
        grid_spec=pltpu.PrefetchScalarGridSpec(
            num_scalar_prefetch=0,
            grid=(num_tiles,),
            in_specs=in_specs,
            out_specs=pl.BlockSpec((tm, Dout), lambda i: (i, 0)),
        ),
        input_output_aliases=io_aliases,
        compiler_params=pltpu.CompilerParams(
            dimension_semantics=("parallel",),
            vmem_limit_bytes=vmem_limit),
    )(*operands)

    return out2d.reshape(B, N, Dout)


if __name__ == "__main__":
    # Module config (small, consistent with LoRALinear defaults: lora_head=False,
    # bias=True, lora_tanh=False, lora_dropout=0 -> identity in eval).
    input_dim = 32
    output_dim = 32
    rank = 4
    lora_alpha = 8.0                      # > 1.5  -> scaling = alpha / rank
    scaling = lora_alpha / rank

    # N = 9 -> M = 18: exercises multi-tile grids AND the ragged last block.
    B, N = 2, 9

    key = jax.random.PRNGKey(0)
    kx, ka, kb, kbias, kbase = jax.random.split(key, 5)

    # Deterministic parameter init. NOTE: the module's default 'He_s' init zeros
    # lora_B (output would be identically zero); we use a Houlsby-style small
    # gaussian init so the kernel path is exercised with nonzero values.
    x = jax.random.normal(kx, (B, N, input_dim), dtype=jnp.float32)
    lora_A = 0.01 * jax.random.normal(ka, (rank, input_dim), dtype=jnp.float32)
    lora_B = 0.01 * jax.random.normal(kb, (output_dim, rank), dtype=jnp.float32)
    bias = 0.01 * jax.random.normal(kbias, (output_dim,), dtype=jnp.float32)
    base = jax.random.normal(kbase, (B, N, output_dim), dtype=jnp.float32)

    # Pure-JAX reference of the PyTorch forward (lora_head=False branch).
    h_ref = jnp.einsum("bnp,rp->bnr", x, lora_A * scaling)
    ref = jnp.einsum("bnr,pr->bnp", h_ref, lora_B) + bias * scaling

    # 1) Default path: auto TM (>= 2 grid steps, ragged last tile).
    out = jax.block_until_ready(
        lora_linear_forward(x, lora_A, lora_B, bias, scaling))
    assert out.shape == (B, N, output_dim)
    assert jnp.allclose(out, ref, atol=1e-5, rtol=1e-5), "mismatch (auto TM)"

    # 2) Forced small TM: 3 tiles with a ragged last block (18 = 8 + 8 + 2).
    out_tiled = jax.block_until_ready(
        lora_linear_forward(x, lora_A, lora_B, bias, scaling, tm=8))
    assert jnp.allclose(out_tiled, ref, atol=1e-5, rtol=1e-5), "mismatch (tm=8)"

    # 3) bias=False configuration.
    out_nb = jax.block_until_ready(
        lora_linear_forward(x, lora_A, lora_B, None, scaling))
    assert jnp.allclose(out_nb, ref - bias * scaling, atol=1e-5, rtol=1e-5), \
        "mismatch (no bias)"

    # 4) Fused downstream residual add (base + lora(x)), aliased in-place.
    out_fused = jax.block_until_ready(
        lora_linear_forward(x, lora_A, lora_B, bias, scaling, base=base))
    assert jnp.allclose(out_fused, base + ref, atol=1e-5, rtol=1e-5), \
        "mismatch (fused base add)"

    print("KERNEL_OK")
</pallas_src>

<mosaic_0001>
module attributes {stable_mosaic.version = 11 : i64} {
  func.func @_lora_kernel(%arg0: i32, %arg1: memref<16x32xf32, #tpu.memory_space<vmem>>, %arg2: memref<32x4xf32, #tpu.memory_space<vmem>>, %arg3: memref<4x32xf32, #tpu.memory_space<vmem>>, %arg4: memref<1x32xf32, #tpu.memory_space<vmem>>, %arg5: memref<16x32xf32, #tpu.memory_space<vmem>>) attributes {dimension_semantics = [#tpu.dimension_semantics<parallel>], iteration_bounds = array<i64: 2>, scalar_prefetch = 0 : i64, scratch_operands = 0 : i64, tpu.core_type = #tpu.core_type<tc>, window_params = [{transform_indices = @transform_0, window_bounds = array<i64: 16, 32>}, {pipeline_mode = #tpu.pipeline_mode<synchronous>, transform_indices = @transform_1, window_bounds = array<i64: 32, 4>}, {pipeline_mode = #tpu.pipeline_mode<synchronous>, transform_indices = @transform_2, window_bounds = array<i64: 4, 32>}, {pipeline_mode = #tpu.pipeline_mode<synchronous>, transform_indices = @transform_3, window_bounds = array<i64: 1, 32>}, {transform_indices = @transform_4, window_bounds = array<i64: 16, 32>}]} {
    %c0 = arith.constant 0 : index
    %c0_0 = arith.constant 0 : index
    %0 = vector.load %arg1[%c0, %c0_0] : memref<16x32xf32, #tpu.memory_space<vmem>>, vector<16x32xf32>
    %c0_1 = arith.constant 0 : index
    %c0_2 = arith.constant 0 : index
    %1 = vector.load %arg2[%c0_1, %c0_2] : memref<32x4xf32, #tpu.memory_space<vmem>>, vector<32x4xf32>
    %cst = arith.constant dense<0.000000e+00> : vector<16x4xf32>
    %2 = tpu.matmul %0, %1, %cst {dimension_numbers = #tpu.dot_dimension_numbers<[1], [0], [0], [1], [0, 0, 1, 1], [], []>} : vector<16x32xf32>, vector<32x4xf32>, vector<16x4xf32> -> vector<16x4xf32>
    %c0_3 = arith.constant 0 : index
    %c0_4 = arith.constant 0 : index
    %3 = vector.load %arg3[%c0_3, %c0_4] : memref<4x32xf32, #tpu.memory_space<vmem>>, vector<4x32xf32>
    %cst_5 = arith.constant dense<0.000000e+00> : vector<16x32xf32>
    %4 = tpu.matmul %2, %3, %cst_5 {dimension_numbers = #tpu.dot_dimension_numbers<[1], [0], [0], [1], [0, 0, 1, 1], [], []>} : vector<16x4xf32>, vector<4x32xf32>, vector<16x32xf32> -> vector<16x32xf32>
    %c0_6 = arith.constant 0 : index
    %c0_7 = arith.constant 0 : index
    %5 = vector.load %arg4[%c0_6, %c0_7] : memref<1x32xf32, #tpu.memory_space<vmem>>, vector<1x32xf32>
    %6 = vector.broadcast %5 : vector<1x32xf32> to vector<16x32xf32>
    %7 = arith.addf %4, %6 : vector<16x32xf32>
    %c0_8 = arith.constant 0 : index
    %c0_9 = arith.constant 0 : index
    %8 = vector.load %arg5[%c0_8, %c0_9] : memref<16x32xf32, #tpu.memory_space<vmem>>, vector<16x32xf32>
    tpu.vector_store %arg5[%c0_8, %c0_9], %7 {strides = array<i32>} : memref<16x32xf32, #tpu.memory_space<vmem>>, vector<16x32xf32>,
    return
  }
  func.func @transform_0(%arg0: i32) -> (i32, i32) {
    %c0_i32 = arith.constant 0 : i32
    %c0_i32_0 = arith.constant 0 : i32
    return %arg0, %c0_i32 : i32, i32
  }
  func.func @transform_1(%arg0: i32) -> (i32, i32) {
    %c0_i32 = arith.constant 0 : i32
    %c0_i32_0 = arith.constant 0 : i32
    %c0_i32_1 = arith.constant 0 : i32
    return %c0_i32, %c0_i32_0 : i32, i32
  }
  func.func @transform_2(%arg0: i32) -> (i32, i32) {
    %c0_i32 = arith.constant 0 : i32
    %c0_i32_0 = arith.constant 0 : i32
    %c0_i32_1 = arith.constant 0 : i32
    return %c0_i32, %c0_i32_0 : i32, i32
  }
  func.func @transform_3(%arg0: i32) -> (i32, i32) {
    %c0_i32 = arith.constant 0 : i32
    %c0_i32_0 = arith.constant 0 : i32
    %c0_i32_1 = arith.constant 0 : i32
    return %c0_i32, %c0_i32_0 : i32, i32
  }
  func.func @transform_4(%arg0: i32) -> (i32, i32) {
    %c0_i32 = arith.constant 0 : i32
    %c0_i32_0 = arith.constant 0 : i32
    return %arg0, %c0_i32 : i32, i32
  }
}

</mosaic_0001>

<bundles_post_ra>
// kernel: tpu_custom_call.1
= control target key start
LH: loop header
LB: loop body
LE: loop exit
PB: predicated region body
PF: predicated region fallthrough
CT: control target
= control target key end

     0   :  { %9 = vsyncpa [#allocation3], 0  ;;  %s816_s0 = inlined_call_operand.vmem [shape: f32[18,32], index: 0, kind: input, shape index: {}]   ;;  %s817_s1 = inlined_call_operand.vmem [shape: f32[32,4], index: 1, kind: input, shape index: {}]   ;;  %s818_s2 = inlined_call_operand.vmem [shape: f32[4,32], index: 2, kind: input, shape index: {}]   ;;  %s819_s3 = inlined_call_operand.vmem [shape: f32[1,32], index: 3, kind: input, shape index: {}]   ;;  %s820_s4 = inlined_call_operand.hbm [shape: f32[18,32], index: 4, kind: output, shape index: {}]  }
   0x1   :  { %11 = vsyncpa [#allocation3 + $0x1], 0  ;;  %s677_s15 = smov 0   ;;  %s679_s16 = smov 0  }
   0x2   :  { %s681_s17 = smov 0   ;;  %s683_s18 = smov 0  }
   0x3 LB: > { %s698_s19 = sadd.s32 4294967295, %s647_s18   ;;  %s489_s20 = sadd.s32 4294967294, %s647_s18   ;;  %s647_s18 = sphi %s683_s18, %s826_s18   ;;  %s643_s17 = sphi %s681_s17, %s825_s17   ;;  %s639_s16 = sphi %s679_s16, %s824_s16   ;;  %s635_s15 = sphi %s677_s15, %s823_s15  }
   0x4   : > { %s702_s21 = sadd.s32 1, %s647_s18   ;;  %s113_s22 = sadd.s32 1, %s643_s17 }
   0x5   : > { %s110_s23 = ssub.s32 %s647_s18, %s702_s21  ;;  %p123_p0 = scmp.ne.s32.totalorder %s643_s17, %s639_s16 }
   0x6   : > { %p111_p1 = scmp.eq.s32.totalorder %s110_s23, 0  ;;  %p124_p2 = scmp.eq.s32.totalorder %s698_s19, 1 }
   0x7   : > { %p129_p3 = scmp.ne.s32.totalorder %s639_s16, %s635_s15  ;;  %p130_p4 = scmp.eq.s32.totalorder %s489_s20, 1 }
   0x8   : > { %s713_s24 = scalar_select %p111_p1, %s643_s17, %s113_s22  }
   0x9   : > { %p715_p5 = por %p124_p2, %p123_p0  ;;  %p719_p6 = por %p130_p4, %p129_p3 }
   0xa   : > { %p492_p7 = scmp.ge.s32.totalorder %s647_s18, 1  ;;  %p174_p8 = scmp.lt.s32.totalorder %s647_s18, 3 }
   0xc   : > { %p175_p9 = pnand %p492_p7, %p174_p8 }
   0xd   : > { %v225_v0 = vld [vmem:[%s817_s1] sm:$0xff] (!%p175_p9)  ;;  %v226_v1 = vld [vmem:[%s817_s1 + $0x8] sm:$0xff] (!%p175_p9)  ;;  %v227_v2 = vld [vmem:[%s817_s1 + $0x10] sm:$0xff] (!%p175_p9)  ;;  %s735_s7 = sshll.u32 (!%p175_p9), %s698_s19, 1  ;;  %vm229_vm0 = vcmask (!%p175_p9), 261120   ;;  %vm326_vm1 = vcmask (!%p175_p9), 1043456  }
   0xe   : > { %178 = sbr.rel (%p175_p9) target bundleno = 485 (0x1e5), region = 36  ;;  %v537_v3 = vpack.c.bf16 (!%p175_p9), %v226_v1, %v225_v0  ;;  %v228_v4 = vld [vmem:[%s817_s1 + $0x18] sm:$0xff] (!%p175_p9)  ;;  %p209_p10 = scmp.lt.s32.totalorder (!%p175_p9), %s735_s7, 2  ;;  %v311_v8 = vld [vmem:[%s818_s2] sm:$0xf] (!%p175_p9)  ;;  %vm319_vm2 = vcmask (!%p175_p9), 31744  }
   0xf   : > { %v541_v5 = vpack.c.bf16 (!%p175_p9), %v228_v4, %v227_v2  ;;  %532 = vmatprep.subr.msk.mxu1 (!%p175_p9), %vm326_vm1, %v311_v8  ;;  %s201_s23 = sand.u32 (!%p175_p9), 1, %s639_s16   ;;  %v498_v11 = vld [vmem:[%s819_s3] ss:$0 sm:$0xff] (!%p175_p9) }
  0x10   : > { %538 = vmatprep.subr.bf16.mxu0 (!%p175_p9), %v537_v3  ;;  %533 = vmatpush3.msk.msra.mxu1 (!%p175_p9), %vm326_vm1, %v311_v8  ;;  %s493_s27 = sshll.u32 (!%p175_p9), %s201_s23, 4  ;;  %s756_s5 = scalar_lea.sflag (!%p175_p9), [#allocation3], %s201_s23 }
  0x11   : > { %540 = vmatpush3.bf16.msra.mxu0 (!%p175_p9), %v537_v3  ;;  %s203_s30 = scalar_lea.vmem (!%p175_p9), [#allocation2], %s493_s27 }
  0x12   : > { %542 = vmatprep.subr.bf16.mxu0 (!%p175_p9), %v541_v5 }
  0x15   : > { %s210_s10 = scalar_select %p209_p10, %s735_s7, 2  ;;  %544 = vmatpush3.bf16.msra.mxu0 %v541_v5 }
  0x16   : > { %s416_s6 = ssub.s32 (%p715_p5), 3, %s735_s7 }
  0x17   : > { %s495_s11 = sshll.u32 %s210_s10, 3  ;;  %p417_p11 = scmp.lt.s32.totalorder (%p715_p5), %s416_s6, 2 }
  0x18   : > { %s212_s14 = scalar_lea.vmem %s816_s0, %s495_s11 }
  0x19   : > { %v223_v6 = vld [vmem:[%s212_s14] sm:$0xff]  ;;  %v224_v7 = vld [vmem:[%s212_s14 + $0x8] sm:$0xff] }
  0x1a   : > { %529 = vmatprep.mubr.msk.f32.mxu0 %vm229_vm0, %v223_v6 }
  0x1b   : > { %530 = vmatmul.mubr.msk.f32.vlgmr.msra.gmra.mrb[0].mxu0 %vm229_vm0, %v224_v7 }
  0xee   : > { %v531_v9 = vpop.f32.mrb[0].mxu0 }
  0xef   : > { %v302_v10 = vpop.f32.mrb[1].mxu0 }
  0xf0   : > { %534 = vmatprep.mubr.msk.f32.mxu1 %vm319_vm2, %v302_v10 }
  0xf1   : > { %535 = vmatmul.mubr.msk.f32.vlgmr.msra.gmra.mrb[0].mxu1 %vm319_vm2, %v531_v9 }
 0x1c2   : > { %414 = sbr.rel (!%p715_p5) target bundleno = 485 (0x1e5), region = 40 }
 0x1c4   : > { %v536_v12 = vpop.f32.mrb[0].mxu1 }
 0x1c5   : > { %v402_v13 = vadd.f32 %v536_v12, %v498_v11  ;;  %v396_v14 = vpop.f32.mrb[1].mxu1 }
 0x1c6   : > { %v397_v15 = vadd.f32 %v498_v11, %v396_v14 }
 0x1c7   : > { %406 = vst.msk [vmem:[%s203_s30 + $0x8] sm:$0xff] %vm229_vm0, %v402_v13 }
 0x1c8   : > { %405 = vst.msk [vmem:[%s203_s30] sm:$0xff] %vm229_vm0, %v397_v15 }
 0x1c9   : > { %s828_s6 = smov (!%p417_p11, %s416_s6), 2 }
 0x1ca   : > { %s761_s8 = sshll.u32 %s828_s6, 7 }
 0x1cb   : > { %s421_s9 = ssub.s32 256, %s761_s8 }
 0x1cc   : > { %422 = vsyncadd %s756_s5, %s421_s9  ;;  %p505_p12 = scmp.ne.s32.totalorder %s761_s8, 0  ;;  %s511_s10 = sshll.u32 %s698_s19, 8 }
 0x1cd   : > { %s770_s25 = scalar_lea.hbm %s820_s4, %s511_s10  ;;  %s427_s13 = sshll.u32 %s203_s30, 4  ;;  %s772_s13 = int_to_ptr.vmem [resolvable:$true] %s427_s13 }
 0x1ce   : > { %s585_s7 = scalar_lea.vmem %s772_s13, %s761_s8  ;;  %s649_s14 = smov [#allocation2]  }
 0x1cf   : > { %p586_p13 = scmp.ne.s32.totalorder %s772_s13, %s585_s7  ;;  %s589_s20 = sshll.u32 %s649_s14, 4  ;;  %s590_s20 = int_to_ptr.vmem [resolvable:$false] %s589_s20 }
 0x1d0   : > { %s591_s19 = scalar_lea.vmem %s590_s20, 512  ;;  %p592_p2 = scmp.lt.s32.totalorder %s772_s13, %s590_s20 }
 0x1d1   : > { %p587_p0 = pnand %p586_p13, %p505_p12  ;;  %p593_p3 = scmp.lt.s32.totalorder %s591_s19, %s585_s7 }
 0x1d3   : > { %p588_p1 = pneg %p587_p0  ;;  %p594_p4 = por %p593_p3, %p592_p2 }
 0x1d5   : > { %p595_p5 = pnand %p594_p4, %p588_p1 }
 0x1d7   : > { %598 = shalt.err (!%p595_p5)
}
 0x1d8   : > { %s599_s22 = scalar_lea.hbm %s770_s25, %s761_s8  ;;  %s603_s28 = scalar_lea.hbm %s820_s4, 384 }
 0x1d9   : > { %p600_p7 = scmp.ne.s32.totalorder %s770_s25, %s599_s22  ;;  %p604_p10 = scmp.lt.u32.totalorder %s770_s25, %s820_s4 }
 0x1da   : > { %p605_p11 = scmp.lt.u32.totalorder %s603_s28, %s599_s22  ;;  %p607_p0 = scmp.lt.u32.totalorder %s599_s22, %s770_s25 }
 0x1db   : > { %p601_p8 = pnand %p600_p7, %p505_p12 }
 0x1dc   : > { %p606_p13 = por %p605_p11, %p604_p10 }
 0x1dd   : > { %p602_p9 = pneg %p601_p8 }
 0x1de   : > { %p608_p1 = por %p607_p0, %p606_p13 }
 0x1e0   : > { %p609_p2 = pnand %p608_p1, %p602_p9 }
 0x1e2   : > { %612 = shalt.err (!%p609_p2)
}
 0x1e3   : > { %s650_s6 = smov 128   ;;  %s651_s9 = smov 8  }
 0x1e4   : > { %433 = dma.vmem_to_hbm [thread:$0]  (%p505_p12), %s772_s13, %s761_s8, %s770_s25, %s756_s5, %s650_s6, %s650_s6, %s651_s9  }
 0x1e5 PF: > { %p550_p3 = scmp.ge.s32.totalorder %s647_s18, 2  ;;  %s442_s10 = sand.u32 1, %s635_s15  }
 0x1e6   : > { %s443_s11 = scalar_lea.sflag [#allocation3], %s442_s10 }
 0x1e7   : > { %p547_p4 = pnand %p550_p3, %p719_p6 }
 0x1e9   : > { %630 = dma.done.wait (!%p547_p4), %s443_s11, 256  }
 0x1ea   : > { %632 = vsyncadd (!%p547_p4), %s443_s11, 4294967040  ;;  %p14_p5 = scmp.ge.s32.totalorder %s702_s21, 4   ;;  %s823_s15 = smov %s639_s16 }
 0x1eb   : > { %s824_s16 = smov %s643_s17  ;;  %s825_s17 = smov %s713_s24 }
 0x1ec   : > { %s826_s18 = smov %s702_s21  ;;  %16 = sbr.rel (!%p14_p5) target bundleno = 3 (0x3), region = 71 }
 0x1f3   :  { %448 = vsyncpa [#allocation3], 1 }
 0x1f4   :  { %450 = vsyncpa [#allocation3 + $0x1], 1 }

</bundles_post_ra>
